<compile_context>
chip_gen: v5e
topology: v5e:2x2
jax: 0.10.0
libtpu: 0.0.40
codegen_flags: <defaults>
</compile_context>

<pallas_src>
import functools

import jax
import jax.numpy as jnp
from jax.experimental import pallas as pl
from jax.experimental.pallas import tpu as pltpu


def _make_divisible(v, divisor, min_value=None):
    if min_value is None:
        min_value = divisor
    new_v = max(min_value, int(v + divisor / 2) // divisor * divisor)
    if new_v < 0.9 * v:
        new_v += divisor
    return new_v


# ------------------------- single-pass (fused) path -------------------------

def _se_fused_kernel(x_ref, w1_ref, b1_ref, w2_ref, b2_ref, o_ref, *, inv_hw):
    # x_ref: (Nb, C, HW); w1_ref: (C, Cr); b1_ref: (1, Cr);
    # w2_ref: (Cr, C);   b2_ref: (1, C);  o_ref: (Nb, C, HW)

    # Global average pool, accumulated in f32 (exact: reduction is over the
    # logical HW extent only).
    pooled = jnp.sum(x_ref[...].astype(jnp.float32), axis=-1) * inv_hw  # (Nb,C)

    # conv_reduce (1x1) + bias + ReLU as a lane-dense matmul.
    se = jnp.dot(pooled, w1_ref[...],
                 preferred_element_type=jnp.float32) + b1_ref[...]
    se = jnp.maximum(se, 0.0)                                           # (Nb,Cr)

    # conv_expand (1x1) + bias.
    gate_pre = jnp.dot(se, w2_ref[...],
                       preferred_element_type=jnp.float32) + b2_ref[...]

    # hard_sigmoid: relu6(v + 3) / 6
    gate = jnp.clip((gate_pre + 3.0) * (1.0 / 6.0), 0.0, 1.0)           # (Nb,C)

    # Re-index x_ref here instead of keeping the big tile live across the
    # gate computation (cheap VMEM reload, no spill traffic).
    o_ref[...] = (x_ref[...] * gate[:, :, None].astype(x_ref.dtype)
                  ).astype(o_ref.dtype)


# ----------------------- fallback (two-pass) path ---------------------------

def _se_gate_kernel(x_ref, w1_ref, b1_ref, w2_ref, b2_ref, g_ref, acc_ref, *,
                    inv_hw, hw_total, thw, need_mask):
    # Pass 1: HW-tiled partial sums; gate computed at the last HW tile.
    hw_i = pl.program_id(1)

    @pl.when(hw_i == 0)
    def _():
        acc_ref[...] = jnp.zeros_like(acc_ref)

    x = x_ref[...].astype(jnp.float32)                          # (1, C, thw)
    if need_mask:
        # Boundary tile may extend past HW; padded lanes hold garbage.
        lane = jax.lax.broadcasted_iota(jnp.int32, x.shape, 2)
        x = jnp.where(hw_i * thw + lane < hw_total, x, 0.0)
    acc_ref[...] += jnp.sum(x, axis=-1)                         # (1, C)

    @pl.when(hw_i == pl.num_programs(1) - 1)
    def _():
        pooled = acc_ref[...] * inv_hw
        se = jnp.dot(pooled, w1_ref[...],
                     preferred_element_type=jnp.float32) + b1_ref[...]
        se = jnp.maximum(se, 0.0)
        gate_pre = jnp.dot(se, w2_ref[...],
                           preferred_element_type=jnp.float32) + b2_ref[...]
        gate = jnp.clip((gate_pre + 3.0) * (1.0 / 6.0), 0.0, 1.0)
        g_ref[...] = gate[:, :, None]


def _se_scale_kernel(x_ref, g_ref, o_ref):
    # Pass 2: HW-tiled elementwise scale (x streamed in its own dtype).
    o_ref[...] = (x_ref[...] * g_ref[...].astype(x_ref.dtype)).astype(o_ref.dtype)


# ------------------------------- wrapper -------------------------------------

def _auto_vmem_params():
    """Generation-aware (block_budget_bytes, vmem_limit_bytes, prefer_even_grid)."""
    cap = None
    try:
        info = pltpu.get_tpu_info()
        cap = getattr(info, "vmem_capacity_bytes", None)
    except Exception:
        cap = None
    if cap is not None and cap >= 120 * 1024 * 1024:
        # v5e / v6e: 128 MiB physical VMEM, single TensorCore.
        return 48 * 1024 * 1024, 100 * 1024 * 1024, False
    if cap is not None and cap <= 80 * 1024 * 1024:
        # v7x-like: ~64 MiB per TC, 2 TCs -> tighter budget, balanced grids.
        return 20 * 1024 * 1024, 48 * 1024 * 1024, True
    # Unknown: conservative defaults that are safe on every generation.
    return 20 * 1024 * 1024, 48 * 1024 * 1024, False


def _pick_nb(n, max_nb, prefer_even_steps):
    """Largest batch-block size dividing n that fits the block budget.
    On dual-TC chips prefer a divisor giving an even (>=2) number of grid
    steps so both cores get equal work."""
    divs = [d for d in range(1, n + 1) if n % d == 0 and d <= max_nb]
    if not divs:
        return 1
    if prefer_even_steps:
        even = [d for d in divs if (n // d) % 2 == 0]
        if even:
            return max(even)
        multi = [d for d in divs if n // d >= 2]
        if multi:
            return max(multi)
    return max(divs)


def _pick_hw_tile(hw, bytes_per_lane, budget_bytes):
    """Largest multiple of 128 (<= padded hw) whose footprint fits the budget."""
    hw_pad = ((hw + 127) // 128) * 128
    best = 128
    t = 128
    while t <= hw_pad:
        if bytes_per_lane * t <= budget_bytes:
            best = t
        t += 128
    return best


def squeeze_excite(x_nchw, w1, b1, w2, b2, *,
                   block_budget_bytes=None, vmem_limit_bytes=None):
    """SE forward. x_nchw: (N, C, H, W) in f32 or bf16; w1: (Cr, C); b1: (Cr,);
    w2: (C, Cr); b2: (C,) (weights/biases float32)."""
    N, C, H, W = x_nchw.shape
    Cr = w1.shape[0]
    HW = H * W
    inv_hw = 1.0 / float(HW)

    auto_budget, auto_limit, prefer_even = _auto_vmem_params()
    if block_budget_bytes is None:
        block_budget_bytes = auto_budget
    if vmem_limit_bytes is None:
        vmem_limit_bytes = auto_limit

    # Contiguous reshape only -- no pad/slice, no extra HBM passes.
    x_flat = x_nchw.reshape(N, C, HW)

    # Pre-transposed weights / row-vector biases: zero layout shuffles in-kernel.
    w1_t = jnp.transpose(w1).astype(jnp.float32)      # (C, Cr)
    w2_t = jnp.transpose(w2).astype(jnp.float32)      # (Cr, C)
    b1_row = b1.reshape(1, Cr).astype(jnp.float32)
    b2_row = b2.reshape(1, C).astype(jnp.float32)

    itemsize = x_flat.dtype.itemsize
    per_image_bytes = C * HW * itemsize
    f32_image_bytes = C * HW * 4
    weight_bytes = 4 * (2 * C * Cr + C + Cr)
    # Fused block footprint per image: x + out blocks double-buffered (4x) plus
    # one f32 temp of the tile for the pooled-sum upcast.
    fused_per_image = 4 * per_image_bytes + f32_image_bytes
    max_nb = (block_budget_bytes - weight_bytes) // fused_per_image

    fused_cost = pl.CostEstimate(
        flops=4 * N * C * Cr + 2 * N * C * HW,
        transcendentals=0,
        bytes_accessed=2 * N * C * HW * itemsize + weight_bytes)

    if max_nb >= 1:
        nb = _pick_nb(N, int(max_nb), prefer_even)
        out_flat = pl.pallas_call(
            functools.partial(_se_fused_kernel, inv_hw=inv_hw),
            out_shape=jax.ShapeDtypeStruct((N, C, HW), x_flat.dtype),
            grid_spec=pltpu.PrefetchScalarGridSpec(
                num_scalar_prefetch=0,
                grid=(N // nb,),
                in_specs=[
                    pl.BlockSpec((nb, C, HW), lambda n: (n, 0, 0)),
                    pl.BlockSpec((C, Cr), lambda n: (0, 0)),
                    pl.BlockSpec((1, Cr), lambda n: (0, 0)),
                    pl.BlockSpec((Cr, C), lambda n: (0, 0)),
                    pl.BlockSpec((1, C), lambda n: (0, 0)),
                ],
                out_specs=pl.BlockSpec((nb, C, HW), lambda n: (n, 0, 0)),
            ),
            compiler_params=pltpu.CompilerParams(
                dimension_semantics=("parallel",),
                vmem_limit_bytes=vmem_limit_bytes),
            cost_estimate=fused_cost,
        )(x_flat, w1_t, b1_row, w2_t, b2_row)
    else:
        # A full image does not fit the VMEM block budget: two passes over x
        # (3x HBM traffic instead of 2x, but feasible on small-VMEM chips).
        lane_in_bytes = C * itemsize
        lane_f32_bytes = C * 4

        # Pass 1 (gate): only the input block is pipelined (2x) + one f32 temp.
        thw_gate = _pick_hw_tile(HW, 2 * lane_in_bytes + lane_f32_bytes,
                                 block_budget_bytes)
        gate_tiles = pl.cdiv(HW, thw_gate)
        need_mask = (HW % thw_gate) != 0

        gate = pl.pallas_call(
            functools.partial(_se_gate_kernel, inv_hw=inv_hw, hw_total=HW,
                              thw=thw_gate, need_mask=need_mask),
            out_shape=jax.ShapeDtypeStruct((N, C, 1), jnp.float32),
            grid_spec=pltpu.PrefetchScalarGridSpec(
                num_scalar_prefetch=0,
                grid=(N, gate_tiles),
                in_specs=[
                    pl.BlockSpec((1, C, thw_gate), lambda n, h: (n, 0, h)),
                    pl.BlockSpec((C, Cr), lambda n, h: (0, 0)),
                    pl.BlockSpec((1, Cr), lambda n, h: (0, 0)),
                    pl.BlockSpec((Cr, C), lambda n, h: (0, 0)),
                    pl.BlockSpec((1, C), lambda n, h: (0, 0)),
                ],
                out_specs=pl.BlockSpec((1, C, 1), lambda n, h: (n, 0, 0)),
                scratch_shapes=[pltpu.VMEM((1, C), jnp.float32)],
            ),
            compiler_params=pltpu.CompilerParams(
                dimension_semantics=("parallel", "arbitrary"),
                vmem_limit_bytes=vmem_limit_bytes),
            cost_estimate=pl.CostEstimate(
                flops=N * C * HW + 4 * N * C * Cr,
                transcendentals=0,
                bytes_accessed=N * C * HW * itemsize + weight_bytes),
        )(x_flat, w1_t, b1_row, w2_t, b2_row)

        # Pass 2 (scale): input + output blocks, each double-buffered.
        thw_scale = _pick_hw_tile(HW, 4 * lane_in_bytes, block_budget_bytes)
        scale_tiles = pl.cdiv(HW, thw_scale)

        out_flat = pl.pallas_call(
            _se_scale_kernel,
            out_shape=jax.ShapeDtypeStruct((N, C, HW), x_flat.dtype),
            grid_spec=pltpu.PrefetchScalarGridSpec(
                num_scalar_prefetch=0,
                grid=(N, scale_tiles),
                in_specs=[
                    pl.BlockSpec((1, C, thw_scale), lambda n, h: (n, 0, h)),
                    pl.BlockSpec((1, C, 1), lambda n, h: (n, 0, 0)),
                ],
                out_specs=pl.BlockSpec((1, C, thw_scale), lambda n, h: (n, 0, h)),
            ),
            compiler_params=pltpu.CompilerParams(
                dimension_semantics=("parallel", "parallel"),
                vmem_limit_bytes=vmem_limit_bytes),
            cost_estimate=pl.CostEstimate(
                flops=N * C * HW,
                transcendentals=0,
                bytes_accessed=2 * N * C * HW * itemsize + N * C * 4),
        )(x_flat, gate)

    return out_flat.reshape(N, C, H, W)


# ------------------------------- reference -----------------------------------

def _reference(x, w1, b1, w2, b2):
    pooled = jnp.mean(x, axis=(2, 3), keepdims=True)            # (N, C, 1, 1)
    se = jnp.einsum('rc,ncij->nrij', w1, pooled) + b1.reshape(1, -1, 1, 1)
    se = jnp.maximum(se, 0.0)
    gate_pre = jnp.einsum('cr,nrij->ncij', w2, se) + b2.reshape(1, -1, 1, 1)
    gate = jnp.clip((gate_pre + 3.0) / 6.0, 0.0, 1.0)
    return x * gate


if __name__ == "__main__":
    se_ratio, divisor = 0.25, 4
    key = jax.random.PRNGKey(0)

    def make_case(k, N, C, H, W):
        Cr = _make_divisible(C * se_ratio, divisor)
        kx, k1, kb1, k2, kb2 = jax.random.split(k, 5)
        x = jax.random.normal(kx, (N, C, H, W), dtype=jnp.float32)
        # Conv2d(in, out, 1) weights collapse to (out, in) matrices.
        w1 = jax.random.normal(k1, (Cr, C), dtype=jnp.float32) * 0.1
        b1 = jax.random.normal(kb1, (Cr,), dtype=jnp.float32) * 0.1
        w2 = jax.random.normal(k2, (C, Cr), dtype=jnp.float32) * 0.1
        b2 = jax.random.normal(kb2, (C,), dtype=jnp.float32) * 0.1
        return x, w1, b1, w2, b2

    key_a, key_b, key_c = jax.random.split(key, 3)

    # Case 1: HW multiple of 128 -> fused single-pass path, batched blocks.
    x, w1, b1, w2, b2 = make_case(key_a, 2, 8, 16, 16)
    out = squeeze_excite(x, w1, b1, w2, b2)
    jax.block_until_ready(out)
    ref = _reference(x, w1, b1, w2, b2)
    assert jnp.allclose(out, ref, atol=1e-5, rtol=1e-5), "fused path mismatch"

    # Case 1b: same inputs streamed in bf16 (gate math stays f32 in-kernel).
    x_bf = x.astype(jnp.bfloat16)
    out_bf = squeeze_excite(x_bf, w1, b1, w2, b2)
    jax.block_until_ready(out_bf)
    ref_bf = _reference(x_bf.astype(jnp.float32), w1, b1, w2, b2)
    assert out_bf.dtype == jnp.bfloat16
    assert jnp.allclose(out_bf.astype(jnp.float32), ref_bf,
                        atol=3e-2, rtol=3e-2), "bf16 path mismatch"

    # Case 2: HW = 49 (not a multiple of 128) -> full-HW block, masked stores.
    x2, w12, b12, w22, b22 = make_case(key_b, 2, 12, 7, 7)
    out2 = squeeze_excite(x2, w12, b12, w22, b22)
    jax.block_until_ready(out2)
    ref2 = _reference(x2, w12, b12, w22, b22)
    assert jnp.allclose(out2, ref2, atol=1e-5, rtol=1e-5), "full-HW path mismatch"

    # Case 3: forced two-pass fallback (tiny block budget), dividing HW tiles.
    out_fb = squeeze_excite(x, w1, b1, w2, b2, block_budget_bytes=16 * 1024)
    jax.block_until_ready(out_fb)
    assert jnp.allclose(out_fb, ref, atol=1e-5, rtol=1e-5), "fallback mismatch"

    # Case 4: forced fallback with HW=400 (not a multiple of 128) exercising
    # the masked partial gate tile and clipped boundary scale tile.
    x4, w14, b14, w24, b24 = make_case(key_c, 2, 8, 20, 20)
    out4 = squeeze_excite(x4, w14, b14, w24, b24, block_budget_bytes=16 * 1024)
    jax.block_until_ready(out4)
    ref4 = _reference(x4, w14, b14, w24, b24)
    assert jnp.allclose(out4, ref4, atol=1e-5, rtol=1e-5), "masked fallback mismatch"

    print("KERNEL_OK")
</pallas_src>

<mosaic_0001>
module attributes {stable_mosaic.version = 11 : i64} {
  func.func @_se_fused_kernel(%arg0: i32, %arg1: memref<2x8x256xf32, #tpu.memory_space<vmem>>, %arg2: memref<8x4xf32, #tpu.memory_space<vmem>>, %arg3: memref<1x4xf32, #tpu.memory_space<vmem>>, %arg4: memref<4x8xf32, #tpu.memory_space<vmem>>, %arg5: memref<1x8xf32, #tpu.memory_space<vmem>>, %arg6: memref<2x8x256xf32, #tpu.memory_space<vmem>>) attributes {dimension_semantics = [#tpu.dimension_semantics<parallel>], iteration_bounds = array<i64: 1>, scalar_prefetch = 0 : i64, scratch_operands = 0 : i64, tpu.core_type = #tpu.core_type<tc>, window_params = [{transform_indices = @transform_0, window_bounds = array<i64: 2, 8, 256>}, {pipeline_mode = #tpu.pipeline_mode<synchronous>, transform_indices = @transform_1, window_bounds = array<i64: 8, 4>}, {pipeline_mode = #tpu.pipeline_mode<synchronous>, transform_indices = @transform_2, window_bounds = array<i64: 1, 4>}, {pipeline_mode = #tpu.pipeline_mode<synchronous>, transform_indices = @transform_3, window_bounds = array<i64: 4, 8>}, {pipeline_mode = #tpu.pipeline_mode<synchronous>, transform_indices = @transform_4, window_bounds = array<i64: 1, 8>}, {transform_indices = @transform_5, window_bounds = array<i64: 2, 8, 256>}]} {
    %c0 = arith.constant 0 : index
    %c0_0 = arith.constant 0 : index
    %c0_1 = arith.constant 0 : index
    %0 = vector.load %arg1[%c0, %c0_0, %c0_1] : memref<2x8x256xf32, #tpu.memory_space<vmem>>, vector<2x8x256xf32>
    %cst = arith.constant dense<0.000000e+00> : vector<2x8xf32>
    %1 = vector.multi_reduction <add>, %0, %cst [2] : vector<2x8x256xf32> to vector<2x8xf32>
    %cst_2 = arith.constant 3.906250e-03 : f32
    %2 = vector.broadcast %cst_2 : f32 to vector<2x8xf32>
    %3 = arith.mulf %1, %2 : vector<2x8xf32>
    %c0_3 = arith.constant 0 : index
    %c0_4 = arith.constant 0 : index
    %4 = vector.load %arg2[%c0_3, %c0_4] : memref<8x4xf32, #tpu.memory_space<vmem>>, vector<8x4xf32>
    %cst_5 = arith.constant dense<0.000000e+00> : vector<2x4xf32>
    %5 = tpu.matmul %3, %4, %cst_5 {dimension_numbers = #tpu.dot_dimension_numbers<[1], [0], [0], [1], [0, 0, 1, 1], [], []>} : vector<2x8xf32>, vector<8x4xf32>, vector<2x4xf32> -> vector<2x4xf32>
    %c0_6 = arith.constant 0 : index
    %c0_7 = arith.constant 0 : index
    %6 = vector.load %arg3[%c0_6, %c0_7] : memref<1x4xf32, #tpu.memory_space<vmem>>, vector<1x4xf32>
    %7 = vector.broadcast %6 : vector<1x4xf32> to vector<2x4xf32>
    %8 = arith.addf %5, %7 : vector<2x4xf32>
    %cst_8 = arith.constant 0.000000e+00 : f32
    %9 = vector.broadcast %cst_8 : f32 to vector<2x4xf32>
    %10 = arith.maximumf %8, %9 : vector<2x4xf32>
    %c0_9 = arith.constant 0 : index
    %c0_10 = arith.constant 0 : index
    %11 = vector.load %arg4[%c0_9, %c0_10] : memref<4x8xf32, #tpu.memory_space<vmem>>, vector<4x8xf32>
    %cst_11 = arith.constant dense<0.000000e+00> : vector<2x8xf32>
    %12 = tpu.matmul %10, %11, %cst_11 {dimension_numbers = #tpu.dot_dimension_numbers<[1], [0], [0], [1], [0, 0, 1, 1], [], []>} : vector<2x4xf32>, vector<4x8xf32>, vector<2x8xf32> -> vector<2x8xf32>
    %c0_12 = arith.constant 0 : index
    %c0_13 = arith.constant 0 : index
    %13 = vector.load %arg5[%c0_12, %c0_13] : memref<1x8xf32, #tpu.memory_space<vmem>>, vector<1x8xf32>
    %14 = vector.broadcast %13 : vector<1x8xf32> to vector<2x8xf32>
    %15 = arith.addf %12, %14 : vector<2x8xf32>
    %cst_14 = arith.constant 3.000000e+00 : f32
    %16 = vector.broadcast %cst_14 : f32 to vector<2x8xf32>
    %17 = arith.addf %15, %16 : vector<2x8xf32>
    %cst_15 = arith.constant 0.166666672 : f32
    %18 = vector.broadcast %cst_15 : f32 to vector<2x8xf32>
    %19 = arith.mulf %17, %18 : vector<2x8xf32>
    %cst_16 = arith.constant 0.000000e+00 : f32
    %cst_17 = arith.constant 1.000000e+00 : f32
    %20 = vector.broadcast %cst_16 : f32 to vector<2x8xf32>
    %21 = arith.maximumf %20, %19 : vector<2x8xf32>
    %22 = vector.broadcast %cst_17 : f32 to vector<2x8xf32>
    %23 = arith.minimumf %22, %21 : vector<2x8xf32>
    %c0_18 = arith.constant 0 : index
    %c0_19 = arith.constant 0 : index
    %c0_20 = arith.constant 0 : index
    %24 = vector.load %arg1[%c0_18, %c0_19, %c0_20] : memref<2x8x256xf32, #tpu.memory_space<vmem>>, vector<2x8x256xf32>
    %25 = vector.shape_cast %23 : vector<2x8xf32> to vector<2x8x1xf32>
    %26 = vector.broadcast %25 : vector<2x8x1xf32> to vector<2x8x256xf32>
    %27 = arith.mulf %24, %26 : vector<2x8x256xf32>
    %c0_21 = arith.constant 0 : index
    %c0_22 = arith.constant 0 : index
    %c0_23 = arith.constant 0 : index
    %28 = vector.load %arg6[%c0_21, %c0_22, %c0_23] : memref<2x8x256xf32, #tpu.memory_space<vmem>>, vector<2x8x256xf32>
    tpu.vector_store %arg6[%c0_21, %c0_22, %c0_23], %27 {strides = array<i32>} : memref<2x8x256xf32, #tpu.memory_space<vmem>>, vector<2x8x256xf32>,
    return
  }
  func.func @transform_0(%arg0: i32) -> (i32, i32, i32) {
    %c0_i32 = arith.constant 0 : i32
    %c0_i32_0 = arith.constant 0 : i32
    %c0_i32_1 = arith.constant 0 : i32
    return %arg0, %c0_i32, %c0_i32_0 : i32, i32, i32
  }
  func.func @transform_1(%arg0: i32) -> (i32, i32) {
    %c0_i32 = arith.constant 0 : i32
    %c0_i32_0 = arith.constant 0 : i32
    %c0_i32_1 = arith.constant 0 : i32
    return %c0_i32, %c0_i32_0 : i32, i32
  }
  func.func @transform_2(%arg0: i32) -> (i32, i32) {
    %c0_i32 = arith.constant 0 : i32
    %c0_i32_0 = arith.constant 0 : i32
    %c0_i32_1 = arith.constant 0 : i32
    return %c0_i32, %c0_i32_0 : i32, i32
  }
  func.func @transform_3(%arg0: i32) -> (i32, i32) {
    %c0_i32 = arith.constant 0 : i32
    %c0_i32_0 = arith.constant 0 : i32
    %c0_i32_1 = arith.constant 0 : i32
    return %c0_i32, %c0_i32_0 : i32, i32
  }
  func.func @transform_4(%arg0: i32) -> (i32, i32) {
    %c0_i32 = arith.constant 0 : i32
    %c0_i32_0 = arith.constant 0 : i32
    %c0_i32_1 = arith.constant 0 : i32
    return %c0_i32, %c0_i32_0 : i32, i32
  }
  func.func @transform_5(%arg0: i32) -> (i32, i32, i32) {
    %c0_i32 = arith.constant 0 : i32
    %c0_i32_0 = arith.constant 0 : i32
    %c0_i32_1 = arith.constant 0 : i32
    return %arg0, %c0_i32, %c0_i32_0 : i32, i32, i32
  }
}

</mosaic_0001>

<bundles_post_ra>
// kernel: tpu_custom_call.1
= control target key start
LH: loop header
LB: loop body
LE: loop exit
PB: predicated region body
PF: predicated region fallthrough
CT: control target
= control target key end

     0   :  { %10 = vsyncpa [#allocation3], 0  ;;  %s285_s0 = inlined_call_operand.hbm [shape: f32[2,8,256], index: 0, kind: input, shape index: {}]   ;;  %s286_s1 = inlined_call_operand.vmem [shape: f32[8,4], index: 1, kind: input, shape index: {}]   ;;  %s287_s2 = inlined_call_operand.vmem [shape: f32[1,4], index: 2, kind: input, shape index: {}]   ;;  %s288_s3 = inlined_call_operand.vmem [shape: f32[4,8], index: 3, kind: input, shape index: {}]   ;;  %s289_s4 = inlined_call_operand.vmem [shape: f32[1,8], index: 4, kind: input, shape index: {}]   ;;  %s290_s5 = inlined_call_operand.hbm [shape: f32[2,8,256], index: 5, kind: output, shape index: {}]  }
   0x1   :  { %11 = vsyncpa [#allocation4], 0  ;;  %s16_s20 = sshll.u32 %s285_s0, 4  ;;  %s227_s21 = smov [#allocation2]   ;;  %s17_s20 = int_to_ptr.hbm [resolvable:$true] %s16_s20 }
   0x2   :  { %s18_s22 = sshll.u32 %s227_s21, 4  ;;  %s228_s23 = smov 256   ;;  %s19_s22 = int_to_ptr.vmem [resolvable:$true] %s18_s22 }
   0x3   :  { %s229_s24 = smov 16  }
   0x4   :  { %24 = dma.hbm_to_vmem [thread:$0]  %s17_s20, 512, %s19_s22, [#allocation3], %s228_s23, %s228_s23, %s229_s24  }
   0x5   :  { %223 = dma.done.wait [#allocation3], 512  }
   0x6   :  { %224 = vsyncadd [#allocation3], 4294966784  ;;  %v37_v0 = vld [vmem:[#allocation2] sm:$0xff]  ;;  %v38_v1 = vld [vmem:[#allocation2 + $0x8] sm:$0xff]  ;;  %v56_v8 = vlaneseq  ;;  %vm60_vm0 = vcmask 1041409   ;;  %vm62_vm1 = vcmask 64512  }
   0x7   :  { %v41_v2 = vadd.f32 %v38_v1, %v37_v0  ;;  %v39_v3 = vld [vmem:[#allocation2 + $0x10] sm:$0xff]  ;;  %v40_v4 = vld [vmem:[#allocation2 + $0x18] sm:$0xff]  ;;  %v49_v6 = vld [vmem:[%s286_s1] sm:$0xff]  ;;  %vm95_vm2 = vcmask 1043456   ;;  %vm91_vm3 = vcmask 31744  }
   0x8   :  { %v44_v5 = vadd.f32 %v40_v4, %v39_v3  ;;  %80 = vmatpush.msra.mxu0 %v49_v6  ;;  %v57_v9 = vand.u32 127, %v56_v8  ;;  %v86_v16 = vld [vmem:[%s288_s3] sm:$0xf]  ;;  %v125_v21 = vshrl.u32 %v56_v8, 7 }
   0x9   :  { %42 = vadd.xlane.f32.xlu0 %v41_v2  ;;  %165 = vmatpush.msk.msra.mxu1 %vm95_vm2, %v86_v16  ;;  %v173_v17 = vld [vmem:[%s287_s2] ss:$0 sm:$0xff]  ;;  %s230_s2 = smov [#allocation5]  }
   0xa   :  { %171 = vset.pattern.permute.xlu1 %v125_v21  ;;  %172 = vset.pattern.permute.xlu0 %v125_v21  ;;  %v174_v22 = vld [vmem:[%s289_s4] ss:$0 sm:$0xff]  ;;  %s149_s3 = sshll.u32 %s230_s2, 4  ;;  %s151_s4 = sshll.u32 %s290_s5, 4  ;;  %s150_s3 = int_to_ptr.vmem [resolvable:$true] %s149_s3  ;;  %s152_s4 = int_to_ptr.hbm [resolvable:$true] %s151_s4 }
  0x11   :  { %45 = vadd.xlane.f32.xlu0 %v44_v5 }
  0x7c   :  { %v43_v7 = vpop.xlane.xlu0 %42 }
  0x7d   :  { %v47_v10 = vmul.f32 0.00390625, %v43_v7 }
  0x7f   :  { %v58_v13 = vperm.slane %v47_v10, %v57_v9 }
  0x84   :  { %v46_v11 = vpop.xlane.xlu0 %45 }
  0x85   :  { %v48_v12 = vmul.f32 0.00390625, %v46_v11 }
  0x87   :  { %v59_v14 = vperm.slane %v48_v12, %v57_v9 }
  0x89   :  { %v61_v15 = vsel %vm60_vm0, %v59_v14, %v58_v13 }
  0x8a   :  { %164 = vmatmul.msk.f32.vlgmr.msra.gmra.mxu0 %vm62_vm1, %v61_v15 }
 0x107   :  { %v82_v18 = vpop.f32.mrf.mxu0 }
 0x108   :  { %v83_v19 = vadd.f32 %v173_v17, %v82_v18 }
 0x10a   :  { %v85_v20 = vmax.f32 %v83_v19, 0.0 }
 0x10c   :  { %166 = vmatmul.msk.f32.vlgmr.msra.gmra.mxu1 %vm91_vm3, %v85_v20 }
 0x189   :  { %v116_v23 = vpop.f32.mrf.mxu1 }
 0x18a   :  { %v117_v24 = vadd.f32 %v174_v22, %v116_v23 }
 0x18c   :  { %v119_v25 = vadd.f32 3.0, %v117_v24 }
 0x18e   :  { %v120_v26 = vmul.f32 0.16666667, %v119_v25 }
 0x190   :  { %v121_v27 = vmax.f32 %v120_v26, 0.0 }
 0x192   :  { %v122_v28 = vmin.f32 %v121_v27, 1.0 }
 0x194   :  { %v123_v29 = vperm.slane %v122_v28, 0  ;;  %v130_v30 = vperm.slane %v122_v28, 1 }
 0x196   :  { %128 = vperm.xlu1 %171, %v123_v29  }
 0x19e   :  { %135 = vperm.xlu1 %171, %v130_v30  }
 0x208   :  { %v129_v31 = vpop.permute.xlu1 %128 }
 0x209   :  { %v137_v32 = vmul.f32 %v129_v31, %v37_v0  ;;  %v138_v33 = vmul.f32 %v129_v31, %v38_v1 }
 0x20b   :  { %141 = vst [vmem:[#allocation5] sm:$0xff] %v137_v32 }
 0x20c   :  { %142 = vst [vmem:[#allocation5 + $0x8] sm:$0xff] %v138_v33 }
 0x210   :  { %v136_v34 = vpop.permute.xlu1 %135 }
 0x211   :  { %v139_v35 = vmul.f32 %v136_v34, %v39_v3  ;;  %v140_v36 = vmul.f32 %v136_v34, %v40_v4 }
 0x213   :  { %143 = vst [vmem:[#allocation5 + $0x10] sm:$0xff] %v139_v35 }
 0x214   :  { %144 = vst [vmem:[#allocation5 + $0x18] sm:$0xff] %v140_v36 }
 0x215   :  { %157 = dma.vmem_to_hbm [thread:$0]  %s150_s3, 512, %s152_s4, [#allocation4], %s228_s23, %s228_s23, %s229_s24  }
 0x216   :  { %225 = dma.done.wait [#allocation4], 512  }
 0x217   :  { %226 = vsyncadd [#allocation4], 4294966784 }
 0x218   :  { %162 = vsyncpa [#allocation3], 1 }
 0x219   :  { %163 = vsyncpa [#allocation4], 1 }

</bundles_post_ra>
